<compile_context>
chip_gen: v5e
topology: v5e:2x2
jax: 0.10.0
libtpu: 0.0.40
codegen_flags: <defaults>
</compile_context>

<pallas_src>
import functools

import jax
import jax.numpy as jnp
from jax.experimental import pallas as pl
from jax.experimental.pallas import tpu as pltpu

LANES = 128


def _focal_ce_kernel(x_ref, t_ref, o_ref, acc_ref, *,
                     num_classes, hw_valid, gamma, alpha, label_smoothing,
                     block_rows, chunk_blocks, total_blocks):
    p = pl.program_id(1)                      # spatial chunk (parallel)
    i = pl.program_id(2)                      # block within chunk (reduction)
    g = p * chunk_blocks + i                  # logical global spatial block

    @pl.when(i == 0)
    def _init():
        acc_ref[...] = jnp.zeros_like(acc_ref)

    t = t_ref[0].astype(jnp.int32)            # (R, 128), one cast per block

    # ---- pass 1: running max over classes (slab-wise VPU maxes) ----
    m = x_ref[0, 0].astype(jnp.float32)
    for c in range(1, num_classes):
        m = jnp.maximum(m, x_ref[0, c].astype(jnp.float32))

    # ---- pass 2: stream classes, keep only (R, 128) live values ----
    eps = float(label_smoothing)
    use_alpha = alpha is not None
    sumexp = jnp.zeros((block_rows, LANES), jnp.float32)
    z_y = jnp.zeros((block_rows, LANES), jnp.float32)
    if use_alpha:
        w_y = jnp.zeros((block_rows, LANES), jnp.float32)
    if eps > 0.0:
        wz_sum = jnp.zeros((block_rows, LANES), jnp.float32)

    for c in range(num_classes):
        xc = x_ref[0, c].astype(jnp.float32)
        zc = xc - m
        sumexp = sumexp + jnp.exp(zc)         # EUP exp + VPU add
        sel = t == c                          # scalar-vs-vector compare
        z_y = jnp.where(sel, zc, z_y)
        if use_alpha:
            a_c = float(alpha[c])
            w_y = jnp.where(sel, a_c, w_y)
            if eps > 0.0:
                wz_sum = wz_sum + a_c * zc
        elif eps > 0.0:
            wz_sum = wz_sum + zc

    lse = jnp.log(sumexp)                     # (R, 128)
    logp_y = z_y - lse
    if use_alpha:
        nll = -(w_y * logp_y)
        w_total = float(sum(alpha))
    else:
        nll = -logp_y
        w_total = float(num_classes)
    if eps > 0.0:
        # smooth = -sum_c w_c * logp_c = lse * sum_c(w_c) - sum_c(w_c * z_c)
        smooth = lse * w_total - wz_sum
        ce = (1.0 - eps) * nll + (eps / num_classes) * smooth
    else:
        ce = nll

    # pt = exp(-ce): EUP op; frees the second target-select + divide.
    pt = jnp.exp(-ce)

    # Focal modulation: specialize small-integer gamma to repeated multiplies.
    gexp = float(gamma)
    one_minus_pt = 1.0 - pt
    if gexp == round(gexp) and 0.0 <= gexp <= 8.0:
        gi = int(round(gexp))
        if gi == 0:
            wgt = jnp.ones_like(ce)
        else:
            wgt = one_minus_pt
            for _ in range(gi - 1):
                wgt = wgt * one_minus_pt
    else:
        wgt = jnp.power(one_minus_pt, gexp)
    focal = wgt * ce                          # (R, 128)

    def _reduce_rows(v):
        # Collapse the row axis down to an (8, 128) slab with pure vreg adds.
        if block_rows % 8 == 0:
            return v.reshape(block_rows // 8, 8, LANES).sum(axis=0)
        return v                              # tiny full-extent block

    fully_valid = (g + 1) * block_rows * LANES <= hw_valid

    @pl.when(fully_valid)
    def _accum_fast():
        # Steady state: no index math, no masking.
        acc_ref[...] += _reduce_rows(focal)

    @pl.when(jnp.logical_not(fully_valid))
    def _accum_masked():
        # Only blocks touching padding / out-of-range rows take this path.
        # jnp.where is a SELECT: Inf/NaN from garbage rows is discarded.
        r_idx = jax.lax.broadcasted_iota(jnp.int32, focal.shape, 0)
        l_idx = jax.lax.broadcasted_iota(jnp.int32, focal.shape, 1)
        pos = (g * block_rows + r_idx) * LANES + l_idx
        masked = jnp.where(pos < hw_valid, focal, 0.0)
        acc_ref[...] += _reduce_rows(masked)

    @pl.when(i == chunk_blocks - 1)
    def _finish():
        o_ref[0, 0] = acc_ref[...]            # raw partial; wrapper sums/scales


def _choose_block_rows(hw_rows, num_classes, itemsize, align):
    # Target ~2 MiB of logits per block (dtype-aware): C * R * 128 * itemsize.
    target_bytes = 2 << 20
    r = target_bytes // max(num_classes * LANES * itemsize, 1)
    r = int(max(align, min(r, 2048)))
    r = (r // align) * align
    if hw_rows <= r:
        return int(hw_rows)                   # full spatial extent (always legal)
    return r


def cost_sensitive_focal_loss(logits, targets, alpha=None, gamma=2.0,
                              label_smoothing=0.0, block_rows_override=None):
    """logits: [N, C, H, W] (f32 or bf16); targets: [N, H, W] integer classes."""
    N, C, H, W = logits.shape
    hw = H * W
    x = logits.reshape(N, C, hw)              # free reshape, keep native dtype
    t32 = targets.reshape(N, hw).astype(jnp.int32)

    rem = (-hw) % LANES                       # pad only the lane axis
    if rem:
        x = jnp.pad(x, ((0, 0), (0, 0), (0, rem)))
        t32 = jnp.pad(t32, ((0, 0), (0, rem)))
    hw_rows = (hw + rem) // LANES

    want_int8 = C <= 127
    align = 32 if want_int8 else 8
    if block_rows_override is not None:
        block_rows = int(min(int(block_rows_override), hw_rows))
        if block_rows < hw_rows:
            block_rows = max(8, (block_rows // 8) * 8)
    else:
        block_rows = _choose_block_rows(hw_rows, C, x.dtype.itemsize, align)

    # int8 targets cut HBM traffic (v5e); require a 32-row-aligned or
    # full-extent block so the sub-32-bit tiling stays legal.
    use_int8 = want_int8 and (block_rows % 32 == 0 or block_rows == hw_rows)
    tgt_dtype = jnp.int8 if use_int8 else jnp.int32
    t = t32.astype(tgt_dtype)

    x = x.reshape(N, C, hw_rows, LANES)
    t = t.reshape(N, hw_rows, LANES)

    total_blocks = pl.cdiv(hw_rows, block_rows)
    # v7x megacore: split the spatial reduction when the batch alone can't
    # feed both TensorCores (harmless on 1-TC v5e/v6e).
    P = 2 if (total_blocks >= 2 and (N <= 2 or N % 2 == 1)) else 1
    chunk_blocks = pl.cdiv(total_blocks, P)

    acc_rows = 8 if block_rows % 8 == 0 else block_rows

    kernel = functools.partial(
        _focal_ce_kernel,
        num_classes=int(C),
        hw_valid=int(hw),
        gamma=float(gamma),
        alpha=None if alpha is None else tuple(float(a) for a in alpha),
        label_smoothing=float(label_smoothing),
        block_rows=int(block_rows),
        chunk_blocks=int(chunk_blocks),
        total_blocks=int(total_blocks),
    )

    # Explicit scoped-VMEM budget: 2x double-buffered inputs + live (R,128)
    # f32 temporaries + headroom.  Capped well under v7x's 64 MiB physical.
    x_block_bytes = C * block_rows * LANES * x.dtype.itemsize
    t_block_bytes = block_rows * LANES * t.dtype.itemsize
    vmem_limit = 2 * (x_block_bytes + t_block_bytes) \
        + 12 * block_rows * LANES * 4 + (4 << 20)
    vmem_limit = int(min(max(vmem_limit, 16 << 20), 48 << 20))

    def x_map(n, p, i):
        g = jnp.minimum(p * chunk_blocks + i, total_blocks - 1)
        return (n, 0, g, 0)

    def t_map(n, p, i):
        g = jnp.minimum(p * chunk_blocks + i, total_blocks - 1)
        return (n, g, 0)

    def o_map(n, p, i):
        return (n, p, 0, 0)

    partials = pl.pallas_call(
        kernel,
        out_shape=jax.ShapeDtypeStruct((N, P, acc_rows, LANES), jnp.float32),
        grid_spec=pltpu.PrefetchScalarGridSpec(
            num_scalar_prefetch=0,
            grid=(N, P, chunk_blocks),
            in_specs=[
                pl.BlockSpec((1, C, block_rows, LANES), x_map),
                pl.BlockSpec((1, block_rows, LANES), t_map),
            ],
            out_specs=pl.BlockSpec((1, 1, acc_rows, LANES), o_map),
            scratch_shapes=[pltpu.VMEM((acc_rows, LANES), jnp.float32)],
        ),
        compiler_params=pltpu.CompilerParams(
            dimension_semantics=("parallel", "parallel", "arbitrary"),
            vmem_limit_bytes=vmem_limit,
        ),
    )(x, t)

    # Tiny final reduction + mean scaling in the wrapper.
    return jnp.sum(partials) * (1.0 / float(N * hw))


def cost_sensitive_focal_loss_ref(logits, targets, alpha=None, gamma=2.0,
                                  label_smoothing=0.0):
    x = logits.astype(jnp.float32)
    C = x.shape[1]
    logp = jax.nn.log_softmax(x, axis=1)
    onehot = jax.nn.one_hot(targets, C, axis=1, dtype=jnp.float32)
    if alpha is not None:
        w = jnp.asarray(alpha, jnp.float32).reshape(1, C, 1, 1)
        wlogp = logp * w
    else:
        wlogp = logp
    nll = -jnp.sum(onehot * wlogp, axis=1)
    eps = float(label_smoothing)
    if eps > 0.0:
        smooth = -jnp.sum(wlogp, axis=1)
        ce = (1.0 - eps) * nll + (eps / C) * smooth
    else:
        ce = nll
    pt = jnp.exp(-ce)
    return jnp.mean((1.0 - pt) ** gamma * ce)


if __name__ == "__main__":
    key = jax.random.PRNGKey(0)
    k1, k2, k3, k4 = jax.random.split(key, 4)

    # Test 1: default path (alpha=None, eps=0), segmentation-style head.
    N, C, H, W = 2, 4, 16, 16
    logits = jax.random.normal(k1, (N, C, H, W), dtype=jnp.float32)
    targets = jax.random.randint(k2, (N, H, W), 0, C, dtype=jnp.int32)
    out = cost_sensitive_focal_loss(logits, targets, alpha=None, gamma=2.0,
                                    label_smoothing=0.0)
    out = jax.block_until_ready(out)
    ref = cost_sensitive_focal_loss_ref(logits, targets, alpha=None, gamma=2.0,
                                        label_smoothing=0.0)
    assert jnp.allclose(out, ref, rtol=1e-5, atol=1e-5), (out, ref)

    # Test 2: class weights + label smoothing (cost-sensitive path).
    alpha = (0.5, 1.0, 2.0, 1.5)
    out2 = cost_sensitive_focal_loss(logits, targets, alpha=alpha, gamma=2.0,
                                     label_smoothing=0.1)
    out2 = jax.block_until_ready(out2)
    ref2 = cost_sensitive_focal_loss_ref(logits, targets, alpha=alpha,
                                         gamma=2.0, label_smoothing=0.1)
    assert jnp.allclose(out2, ref2, rtol=1e-5, atol=1e-5), (out2, ref2)

    # Test 3: multi-block spatial reduction + ragged tail + parallel spatial
    # split (small block_rows forced for coverage at small shapes).
    N3, C3, H3, W3 = 1, 4, 50, 50
    logits3 = jax.random.normal(k3, (N3, C3, H3, W3), dtype=jnp.float32)
    targets3 = jax.random.randint(k4, (N3, H3, W3), 0, C3, dtype=jnp.int32)
    out3 = cost_sensitive_focal_loss(logits3, targets3, gamma=2.0,
                                     block_rows_override=8)
    out3 = jax.block_until_ready(out3)
    ref3 = cost_sensitive_focal_loss_ref(logits3, targets3, gamma=2.0)
    assert jnp.allclose(out3, ref3, rtol=1e-5, atol=1e-5), (out3, ref3)

    print("KERNEL_OK")
</pallas_src>

<mosaic_0001>
module attributes {stable_mosaic.version = 11 : i64} {
  func.func @_focal_ce_kernel(%arg0: i32, %arg1: i32, %arg2: i32, %arg3: memref<1x4x2x128xf32, #tpu.memory_space<vmem>>, %arg4: memref<1x2x128xi8, #tpu.memory_space<vmem>>, %arg5: memref<1x1x2x128xf32, #tpu.memory_space<vmem>>, %arg6: memref<2x128xf32, #tpu.memory_space<vmem>>) attributes {dimension_semantics = [#tpu.dimension_semantics<parallel>, #tpu.dimension_semantics<parallel>, #tpu.dimension_semantics<arbitrary>], iteration_bounds = array<i64: 2, 1, 1>, scalar_prefetch = 0 : i64, scratch_operands = 1 : i64, tpu.core_type = #tpu.core_type<tc>, window_params = [{transform_indices = @transform_0, window_bounds = array<i64: 1, 4, 2, 128>}, {transform_indices = @transform_1, window_bounds = array<i64: 1, 2, 128>}, {transform_indices = @transform_2, window_bounds = array<i64: 1, 1, 2, 128>}]} {
    %c1_i32 = arith.constant 1 : i32
    %0 = arith.muli %arg1, %c1_i32 : i32
    %1 = arith.addi %0, %arg2 : i32
    %c0_i32 = arith.constant 0 : i32
    %2 = arith.cmpi eq, %arg2, %c0_i32 : i32
    %3 = arith.extui %2 : i1 to i32
    %c0_i32_0 = arith.constant 0 : i32
    %4 = arith.cmpi ne, %3, %c0_i32_0 : i32
    scf.if %4 {
      %cst_44 = arith.constant 0.000000e+00 : f32
      %76 = vector.broadcast %cst_44 : f32 to vector<2x128xf32>
      %c0_45 = arith.constant 0 : index
      %c0_46 = arith.constant 0 : index
      %77 = vector.load %arg6[%c0_45, %c0_46] : memref<2x128xf32, #tpu.memory_space<vmem>>, vector<2x128xf32>
      tpu.vector_store %arg6[%c0_45, %c0_46], %76 {strides = array<i32>} : memref<2x128xf32, #tpu.memory_space<vmem>>, vector<2x128xf32>,
    } else {
    }
    %c0 = arith.constant 0 : index
    %c0_1 = arith.constant 0 : index
    %c0_2 = arith.constant 0 : index
    %5 = vector.load %arg4[%c0, %c0_1, %c0_2] : memref<1x2x128xi8, #tpu.memory_space<vmem>>, vector<1x2x128xi8>
    %6 = vector.shape_cast %5 : vector<1x2x128xi8> to vector<2x128xi8>
    %7 = arith.extsi %6 : vector<2x128xi8> to vector<2x128xi32>
    %c0_3 = arith.constant 0 : index
    %c0_4 = arith.constant 0 : index
    %c0_5 = arith.constant 0 : index
    %c0_6 = arith.constant 0 : index
    %8 = vector.load %arg3[%c0_3, %c0_4, %c0_5, %c0_6] : memref<1x4x2x128xf32, #tpu.memory_space<vmem>>, vector<1x1x2x128xf32>
    %9 = vector.shape_cast %8 : vector<1x1x2x128xf32> to vector<2x128xf32>
    %c0_7 = arith.constant 0 : index
    %c1 = arith.constant 1 : index
    %c0_8 = arith.constant 0 : index
    %c0_9 = arith.constant 0 : index
    %10 = vector.load %arg3[%c0_7, %c1, %c0_8, %c0_9] : memref<1x4x2x128xf32, #tpu.memory_space<vmem>>, vector<1x1x2x128xf32>
    %11 = vector.shape_cast %10 : vector<1x1x2x128xf32> to vector<2x128xf32>
    %12 = arith.maximumf %9, %11 : vector<2x128xf32>
    %c0_10 = arith.constant 0 : index
    %c2 = arith.constant 2 : index
    %c0_11 = arith.constant 0 : index
    %c0_12 = arith.constant 0 : index
    %13 = vector.load %arg3[%c0_10, %c2, %c0_11, %c0_12] : memref<1x4x2x128xf32, #tpu.memory_space<vmem>>, vector<1x1x2x128xf32>
    %14 = vector.shape_cast %13 : vector<1x1x2x128xf32> to vector<2x128xf32>
    %15 = arith.maximumf %12, %14 : vector<2x128xf32>
    %c0_13 = arith.constant 0 : index
    %c3 = arith.constant 3 : index
    %c0_14 = arith.constant 0 : index
    %c0_15 = arith.constant 0 : index
    %16 = vector.load %arg3[%c0_13, %c3, %c0_14, %c0_15] : memref<1x4x2x128xf32, #tpu.memory_space<vmem>>, vector<1x1x2x128xf32>
    %17 = vector.shape_cast %16 : vector<1x1x2x128xf32> to vector<2x128xf32>
    %18 = arith.maximumf %15, %17 : vector<2x128xf32>
    %cst = arith.constant 0.000000e+00 : f32
    %19 = vector.broadcast %cst : f32 to vector<2x128xf32>
    %cst_16 = arith.constant 0.000000e+00 : f32
    %20 = vector.broadcast %cst_16 : f32 to vector<2x128xf32>
    %c0_17 = arith.constant 0 : index
    %c0_18 = arith.constant 0 : index
    %c0_19 = arith.constant 0 : index
    %c0_20 = arith.constant 0 : index
    %21 = vector.load %arg3[%c0_17, %c0_18, %c0_19, %c0_20] : memref<1x4x2x128xf32, #tpu.memory_space<vmem>>, vector<1x1x2x128xf32>
    %22 = vector.shape_cast %21 : vector<1x1x2x128xf32> to vector<2x128xf32>
    %23 = arith.subf %22, %18 : vector<2x128xf32>
    %24 = math.exp %23 : vector<2x128xf32>
    %25 = arith.addf %19, %24 : vector<2x128xf32>
    %c0_i32_21 = arith.constant 0 : i32
    %26 = vector.broadcast %c0_i32_21 : i32 to vector<2x128xi32>
    %27 = arith.cmpi eq, %7, %26 : vector<2x128xi32>
    %28 = arith.select %27, %23, %20 : vector<2x128xi1>, vector<2x128xf32>
    %c0_22 = arith.constant 0 : index
    %c1_23 = arith.constant 1 : index
    %c0_24 = arith.constant 0 : index
    %c0_25 = arith.constant 0 : index
    %29 = vector.load %arg3[%c0_22, %c1_23, %c0_24, %c0_25] : memref<1x4x2x128xf32, #tpu.memory_space<vmem>>, vector<1x1x2x128xf32>
    %30 = vector.shape_cast %29 : vector<1x1x2x128xf32> to vector<2x128xf32>
    %31 = arith.subf %30, %18 : vector<2x128xf32>
    %32 = math.exp %31 : vector<2x128xf32>
    %33 = arith.addf %25, %32 : vector<2x128xf32>
    %c1_i32_26 = arith.constant 1 : i32
    %34 = vector.broadcast %c1_i32_26 : i32 to vector<2x128xi32>
    %35 = arith.cmpi eq, %7, %34 : vector<2x128xi32>
    %36 = arith.select %35, %31, %28 : vector<2x128xi1>, vector<2x128xf32>
    %c0_27 = arith.constant 0 : index
    %c2_28 = arith.constant 2 : index
    %c0_29 = arith.constant 0 : index
    %c0_30 = arith.constant 0 : index
    %37 = vector.load %arg3[%c0_27, %c2_28, %c0_29, %c0_30] : memref<1x4x2x128xf32, #tpu.memory_space<vmem>>, vector<1x1x2x128xf32>
    %38 = vector.shape_cast %37 : vector<1x1x2x128xf32> to vector<2x128xf32>
    %39 = arith.subf %38, %18 : vector<2x128xf32>
    %40 = math.exp %39 : vector<2x128xf32>
    %41 = arith.addf %33, %40 : vector<2x128xf32>
    %c2_i32 = arith.constant 2 : i32
    %42 = vector.broadcast %c2_i32 : i32 to vector<2x128xi32>
    %43 = arith.cmpi eq, %7, %42 : vector<2x128xi32>
    %44 = arith.select %43, %39, %36 : vector<2x128xi1>, vector<2x128xf32>
    %c0_31 = arith.constant 0 : index
    %c3_32 = arith.constant 3 : index
    %c0_33 = arith.constant 0 : index
    %c0_34 = arith.constant 0 : index
    %45 = vector.load %arg3[%c0_31, %c3_32, %c0_33, %c0_34] : memref<1x4x2x128xf32, #tpu.memory_space<vmem>>, vector<1x1x2x128xf32>
    %46 = vector.shape_cast %45 : vector<1x1x2x128xf32> to vector<2x128xf32>
    %47 = arith.subf %46, %18 : vector<2x128xf32>
    %48 = math.exp %47 : vector<2x128xf32>
    %49 = arith.addf %41, %48 : vector<2x128xf32>
    %c3_i32 = arith.constant 3 : i32
    %50 = vector.broadcast %c3_i32 : i32 to vector<2x128xi32>
    %51 = arith.cmpi eq, %7, %50 : vector<2x128xi32>
    %52 = arith.select %51, %47, %44 : vector<2x128xi1>, vector<2x128xf32>
    %53 = math.log %49 : vector<2x128xf32>
    %54 = arith.subf %52, %53 : vector<2x128xf32>
    %cst_35 = arith.constant 0.000000e+00 : f32
    %55 = vector.broadcast %cst_35 : f32 to vector<2x128xf32>
    %56 = arith.subf %55, %54 : vector<2x128xf32>
    %cst_36 = arith.constant 0.000000e+00 : f32
    %57 = vector.broadcast %cst_36 : f32 to vector<2x128xf32>
    %58 = arith.subf %57, %56 : vector<2x128xf32>
    %59 = math.exp %58 : vector<2x128xf32>
    %cst_37 = arith.constant 1.000000e+00 : f32
    %60 = vector.broadcast %cst_37 : f32 to vector<2x128xf32>
    %61 = arith.subf %60, %59 : vector<2x128xf32>
    %62 = arith.mulf %61, %61 : vector<2x128xf32>
    %63 = arith.mulf %62, %56 : vector<2x128xf32>
    %c1_i32_38 = arith.constant 1 : i32
    %64 = arith.addi %1, %c1_i32_38 : i32
    %c2_i32_39 = arith.constant 2 : i32
    %65 = arith.muli %64, %c2_i32_39 : i32
    %c128_i32 = arith.constant 128 : i32
    %66 = arith.muli %65, %c128_i32 : i32
    %c256_i32 = arith.constant 256 : i32
    %67 = arith.cmpi sle, %66, %c256_i32 : i32
    %68 = arith.extui %67 : i1 to i32
    %c0_i32_40 = arith.constant 0 : i32
    %69 = arith.cmpi ne, %68, %c0_i32_40 : i32
    scf.if %69 {
      %c0_44 = arith.constant 0 : index
      %c0_45 = arith.constant 0 : index
      %76 = vector.load %arg6[%c0_44, %c0_45] : memref<2x128xf32, #tpu.memory_space<vmem>>, vector<2x128xf32>
      %77 = arith.addf %76, %63 : vector<2x128xf32>
      %c0_46 = arith.constant 0 : index
      %c0_47 = arith.constant 0 : index
      %78 = vector.load %arg6[%c0_46, %c0_47] : memref<2x128xf32, #tpu.memory_space<vmem>>, vector<2x128xf32>
      tpu.vector_store %arg6[%c0_46, %c0_47], %77 {strides = array<i32>} : memref<2x128xf32, #tpu.memory_space<vmem>>, vector<2x128xf32>,
    } else {
    }
    %true = arith.constant true
    %70 = arith.xori %67, %true : i1
    %71 = arith.extui %70 : i1 to i32
    %c0_i32_41 = arith.constant 0 : i32
    %72 = arith.cmpi ne, %71, %c0_i32_41 : i32
    scf.if %72 {
      %76 = tpu.iota {dimensions = array<i32: 0>} : vector<2x128xi32>
      %77 = tpu.iota {dimensions = array<i32: 1>} : vector<2x128xi32>
      %c2_i32_44 = arith.constant 2 : i32
      %78 = arith.muli %1, %c2_i32_44 : i32
      %79 = vector.broadcast %78 : i32 to vector<2x128xi32>
      %80 = arith.addi %79, %76 : vector<2x128xi32>
      %c128_i32_45 = arith.constant 128 : i32
      %81 = vector.broadcast %c128_i32_45 : i32 to vector<2x128xi32>
      %82 = arith.muli %80, %81 : vector<2x128xi32>
      %83 = arith.addi %82, %77 : vector<2x128xi32>
      %c256_i32_46 = arith.constant 256 : i32
      %84 = vector.broadcast %c256_i32_46 : i32 to vector<2x128xi32>
      %85 = arith.cmpi slt, %83, %84 : vector<2x128xi32>
      %cst_47 = arith.constant 0.000000e+00 : f32
      %86 = vector.broadcast %cst_47 : f32 to vector<2x128xf32>
      %87 = arith.select %85, %63, %86 : vector<2x128xi1>, vector<2x128xf32>
      %c0_48 = arith.constant 0 : index
      %c0_49 = arith.constant 0 : index
      %88 = vector.load %arg6[%c0_48, %c0_49] : memref<2x128xf32, #tpu.memory_space<vmem>>, vector<2x128xf32>
      %89 = arith.addf %88, %87 : vector<2x128xf32>
      %c0_50 = arith.constant 0 : index
      %c0_51 = arith.constant 0 : index
      %90 = vector.load %arg6[%c0_50, %c0_51] : memref<2x128xf32, #tpu.memory_space<vmem>>, vector<2x128xf32>
      tpu.vector_store %arg6[%c0_50, %c0_51], %89 {strides = array<i32>} : memref<2x128xf32, #tpu.memory_space<vmem>>, vector<2x128xf32>,
    } else {
    }
    %c0_i32_42 = arith.constant 0 : i32
    %73 = arith.cmpi eq, %arg2, %c0_i32_42 : i32
    %74 = arith.extui %73 : i1 to i32
    %c0_i32_43 = arith.constant 0 : i32
    %75 = arith.cmpi ne, %74, %c0_i32_43 : i32
    scf.if %75 {
      %c0_44 = arith.constant 0 : index
      %c0_45 = arith.constant 0 : index
      %76 = vector.load %arg6[%c0_44, %c0_45] : memref<2x128xf32, #tpu.memory_space<vmem>>, vector<2x128xf32>
      %c0_46 = arith.constant 0 : index
      %c0_47 = arith.constant 0 : index
      %c0_48 = arith.constant 0 : index
      %c0_49 = arith.constant 0 : index
      %77 = vector.load %arg5[%c0_46, %c0_47, %c0_48, %c0_49] : memref<1x1x2x128xf32, #tpu.memory_space<vmem>>, vector<1x1x2x128xf32>
      %78 = vector.shape_cast %77 : vector<1x1x2x128xf32> to vector<2x128xf32>
      %79 = vector.shape_cast %76 : vector<2x128xf32> to vector<1x1x2x128xf32>
      tpu.vector_store %arg5[%c0_46, %c0_47, %c0_48, %c0_49], %79 {strides = array<i32>} : memref<1x1x2x128xf32, #tpu.memory_space<vmem>>, vector<1x1x2x128xf32>,
    } else {
    }
    return
  }
  func.func @transform_0(%arg0: i32, %arg1: i32, %arg2: i32) -> (i32, i32, i32, i32) {
    %c1_i32 = arith.constant 1 : i32
    %0 = arith.muli %arg1, %c1_i32 : i32
    %1 = arith.addi %0, %arg2 : i32
    %c0_i32 = arith.constant 0 : i32
    %2 = arith.minsi %1, %c0_i32 : i32
    %c0_i32_0 = arith.constant 0 : i32
    %c0_i32_1 = arith.constant 0 : i32
    %c0_i32_2 = arith.constant 0 : i32
    return %arg0, %c0_i32_0, %2, %c0_i32_1 : i32, i32, i32, i32
  }
  func.func @transform_1(%arg0: i32, %arg1: i32, %arg2: i32) -> (i32, i32, i32) {
    %c1_i32 = arith.constant 1 : i32
    %0 = arith.muli %arg1, %c1_i32 : i32
    %1 = arith.addi %0, %arg2 : i32
    %c0_i32 = arith.constant 0 : i32
    %2 = arith.minsi %1, %c0_i32 : i32
    %c0_i32_0 = arith.constant 0 : i32
    %c0_i32_1 = arith.constant 0 : i32
    return %arg0, %2, %c0_i32_0 : i32, i32, i32
  }
  func.func @transform_2(%arg0: i32, %arg1: i32, %arg2: i32) -> (i32, i32, i32, i32) {
    %c0_i32 = arith.constant 0 : i32
    %c0_i32_0 = arith.constant 0 : i32
    %c0_i32_1 = arith.constant 0 : i32
    return %arg0, %arg1, %c0_i32, %c0_i32_0 : i32, i32, i32, i32
  }
}

</mosaic_0001>

<bundles_post_ra>
// kernel: tpu_custom_call.1
= control target key start
LH: loop header
LB: loop body
LE: loop exit
PB: predicated region body
PF: predicated region fallthrough
CT: control target
= control target key end

     0   :  { %7 = vsyncpa [#allocation4], 0  ;;  %s860_s0 = inlined_call_operand.hbm [shape: f32[2,4,2,128], index: 0, kind: input, shape index: {}]   ;;  %s861_s1 = inlined_call_operand.hbm [shape: s8[2,2,128], index: 1, kind: input, shape index: {}]   ;;  %s862_s2 = inlined_call_operand.hbm [shape: f32[2,1,2,128], index: 2, kind: output, shape index: {}]  }
   0x1   :  { %9 = vsyncpa [#allocation4 + $0x1], 0 }
   0x2   :  { %10 = vsyncpa [#allocation7], 0 }
   0x3   :  { %12 = vsyncpa [#allocation7 + $0x1], 0 }
   0x4   :  { %13 = vsyncpa [#allocation5], 0 }
   0x5   :  { %15 = vsyncpa [#allocation5 + $0x1], 0  ;;  %s721_s9 = smov 0   ;;  %s723_s10 = smov 0  }
   0x6   :  { %s725_s11 = smov 0   ;;  %s727_s12 = smov 0  }
   0x7   :  { %s729_s13 = smov 0   ;;  %s731_s14 = smov 0  }
   0x8 LB: > { %s455_s15 = sadd.s32 4294967295, %s701_s14   ;;  %s456_s16 = sadd.s32 4294967294, %s701_s14   ;;  %s701_s14 = sphi %s731_s14, %s21_s14   ;;  %s697_s13 = sphi %s729_s13, %s872_s13   ;;  %s693_s12 = sphi %s727_s12, %s871_s12   ;;  %s689_s11 = sphi %s725_s11, %s870_s11   ;;  %s685_s10 = sphi %s723_s10, %s869_s10   ;;  %s681_s9 = sphi %s721_s9, %s868_s9  }
   0x9   : > { %s40_s17 = sadd.s32 1, %s697_s13  ;;  %s55_s18 = sadd.s32 1, %s689_s11 }
   0xa   : > { %p42_p0 = scmp.ge.s32.totalorder %s40_s17, 2  ;;  %p62_p1 = scmp.ne.s32.totalorder %s689_s11, %s685_s10 }
   0xb   : > { %p63_p2 = scmp.eq.s32.totalorder %s701_s14, 0  ;;  %p68_p3 = scmp.ne.s32.totalorder %s685_s10, %s681_s9 }
   0xc   : > { %s874_s17 = smov (%p42_p0, %s40_s17), 0  ;;  %p69_p5 = scmp.eq.s32.totalorder %s455_s15, 0 }
   0xd   : > { %p762_p4 = por %p63_p2, %p62_p1  ;;  %s50_s20 = ssub.s32 %s697_s13, %s874_s17 }
   0xe   : > { %p128_p6 = scmp.eq.s32.totalorder %s455_s15, 1  ;;  %p53_p7 = scmp.eq.s32.totalorder %s50_s20, 0 }
   0xf   : > { %p768_p8 = por %p69_p5, %p68_p3  ;;  %p134_p10 = scmp.eq.s32.totalorder %s456_s16, 1 }
  0x10   : > { %p772_p9 = por %p128_p6, %p62_p1  ;;  %p458_p12 = scmp.ge.s32.totalorder %s701_s14, 2 }
  0x11   : > { %s777_s23 = scalar_select %p53_p7, %s689_s11, %s55_s18  }
  0x12   : > { %p779_p11 = por %p134_p10, %p68_p3  ;;  %p490_p13 = scmp.lt.s32.totalorder %s701_s14, 2 }
  0x13   : > { %s154_s25 = sand.u32 1, %s689_s11   ;;  %s472_s27 = sshll.u32 %s697_s13, 3 }
  0x14   : > { %s459_s26 = sshll.u32 %s154_s25, 3  ;;  %s167_s30 = scalar_lea.hbm %s860_s0, %s472_s27 }
  0x15   : > { %s158_s3 = scalar_lea.vmem [#allocation3], %s459_s26  ;;  %s168_s5 = sshll.u32 %s167_s30, 4  ;;  %s169_s5 = int_to_ptr.hbm [resolvable:$true] %s168_s5 }
  0x16   : > { %s170_s4 = sshll.u32 %s158_s3, 4  ;;  %p792_p0 = pnand %p490_p13, %p762_p4  ;;  %s171_s4 = int_to_ptr.vmem [resolvable:$true] %s170_s4 }
  0x17   : > { %p462_p1 = scmp.ge.s32.totalorder %s701_s14, 1  ;;  %s155_s7 = scalar_lea.sflag [#allocation4], %s154_s25 }
  0x18   : > { %s703_s8 = smov 32   ;;  %s704_s15 = smov 2  }
  0x19   : > { %482 = dma.hbm_to_vmem [thread:$0]  (!%p792_p0), %s169_s5, 128, %s171_s4, %s155_s7, %s703_s8, %s703_s8, %s704_s15  }
  0x1a   : > { %p199_p2 = scmp.lt.s32.totalorder %s701_s14, 3  ;;  %s190_s20 = scalar_lea.hbm %s861_s1, %s697_s13 }
  0x1b   : > { %s192_s26 = sshll.u32 %s190_s20, 4  ;;  %s183_s19 = scalar_lea.vmem [#allocation6], %s154_s25  ;;  %s193_s26 = int_to_ptr.hbm [resolvable:$true] %s192_s26 }
  0x1c   : > { %p200_p3 = pnand %p462_p1, %p199_p2  ;;  %s194_s27 = sshll.u32 %s183_s19, 4  ;;  %s195_s27 = int_to_ptr.vmem [resolvable:$true] %s194_s27 }
  0x1d   : > { %s181_s28 = scalar_lea.sflag [#allocation7], %s154_s25  ;;  %s807_s29 = sand.u32 (!%p200_p3), 1, %s685_s10  }
  0x1e   : > { %485 = dma.hbm_to_vmem [thread:$0]  (!%p792_p0), %s193_s26, 16, %s195_s27, %s181_s28  }
  0x1f   : > { %203 = sbr.rel (%p200_p3) target bundleno = 107 (0x6b), region = 28  ;;  %s463_s30 = sshll.u32 (!%p200_p3), %s807_s29, 3 }
  0x20   : > { %s206_s3 = scalar_lea.sflag (!%p200_p3), [#allocation4], %s807_s29  ;;  %s209_s4 = scalar_lea.vmem (!%p200_p3), [#allocation3], %s463_s30 }
  0x24   : > { %668 = dma.done.wait (%p768_p8), %s206_s3, 128  }
  0x25   : > { %670 = vsyncadd (%p768_p8), %s206_s3, 4294967168  ;;  %s216_s25 = scalar_lea.sflag [#allocation7], %s807_s29  ;;  %s218_s5 = scalar_lea.vmem [#allocation6], %s807_s29 }
  0x26   : > { %672 = dma.done.wait (%p768_p8), %s216_s25, 16  }
  0x27   : > { %674 = vsyncadd (%p768_p8), %s216_s25, 4294967280  ;;  %v705_v0 = vmov 0.0   ;;  %v258_v1 = vld [vmem:[%s209_s4] sm:$0x3]  ;;  %v465_v2 = vld [vmem:[%s209_s4 + $0x2] sm:$0x3] }
  0x28   : > { %255 = vst [vmem:[#allocation2] sm:$0x3] %v705_v0  ;;  %v261_v3 = vmax.f32 %v258_v1, %v465_v2  ;;  %v466_v4 = vld [vmem:[%s209_s4 + $0x4] sm:$0x3]  ;;  %v467_v5 = vld [vmem:[%s209_s4 + $0x6] sm:$0x3] }
  0x29   : > { %v256_v16 = vld [vmem:[%s218_s5] sm:$0x1]  ;;  %s464_s21 = sshll.u32 %s807_s29, 1  ;;  %s469_s6 = sshll.u32 %s693_s12, 1 }
  0x2a   : > { %v264_v6 = vmax.f32 %v261_v3, %v466_v4  ;;  %v257_v17 = vunpack.c.0.s8 %v256_v16  ;;  %s346_s15 = scalar_lea.hbm %s862_s2, %s469_s6  ;;  %s243_s16 = scalar_lea.vmem [#allocation8], %s464_s21 }
  0x2b   : > { %s348_s18 = sshll.u32 %s243_s16, 4  ;;  %s350_s20 = sshll.u32 %s346_s15, 4  ;;  %s349_s18 = int_to_ptr.vmem [resolvable:$true] %s348_s18  ;;  %s351_s20 = int_to_ptr.hbm [resolvable:$true] %s350_s20 }
  0x2c   : > { %v267_v7 = vmax.f32 %v264_v6, %v467_v5  ;;  %vm272_vm0 = vcmp.eq.s32.totalorder %v257_v17, 0  ;;  %vm278_vm1 = vcmp.eq.s32.totalorder %v257_v17, 1  ;;  %vm284_vm2 = vcmp.eq.s32.totalorder %v257_v17, 2  ;;  %s335_s26 = scalar_lea.sflag [#allocation5], %s807_s29  ;;  %s629_s19 = sshra.s32 %s351_s20, 4  ;;  %s630_s19 = int_to_ptr.hbm [resolvable:$true] %s629_s19 }
  0x2d   : > { %vm290_vm3 = vcmp.eq.s32.totalorder %v257_v17, 3  ;;  %s631_s27 = scalar_lea.hbm %s630_s19, 2  ;;  %s635_s30 = scalar_lea.hbm %s862_s2, 4 }
  0x2e   : > { %v268_v8 = vsub.f32 %v258_v1, %v267_v7  ;;  %v274_v9 = vsub.f32 %v465_v2, %v267_v7  ;;  %v280_v10 = vsub.f32 %v466_v4, %v267_v7  ;;  %v286_v11 = vsub.f32 %v467_v5, %v267_v7  ;;  %p632_p4 = scmp.ne.s32.totalorder %s630_s19, %s631_s27  ;;  %p636_p7 = scmp.lt.s32.totalorder %s630_s19, %s862_s2 }
  0x2f   : > { %v308_v38 = vld [vmem:[#allocation2] sm:$0x3]  ;;  %p637_p8 = scmp.lt.s32.totalorder %s635_s30, %s631_s27 }
  0x30   : > { %v269_v12 = vmul.f32 1.442695, %v268_v8  ;;  %v275_v13 = vmul.f32 1.442695, %v274_v9  ;;  %v281_v14 = vmul.f32 1.442695, %v280_v10  ;;  %p633_p5 = pnand %p632_p4, %p772_p9 }
  0x31   : > { %v287_v15 = vmul.f32 1.442695, %v286_v11  ;;  %v273_v24 = vsel %vm272_vm0, %v268_v8, 0.0  ;;  %p638_p10 = por %p637_p8, %p636_p7 }
  0x32   : > { %543 = vpow2.f32 %v269_v12  ;;  %v279_v26 = vsel %vm278_vm1, %v274_v9, %v273_v24  ;;  %p634_p6 = pneg %p633_p5 }
  0x33   : > { %545 = vpow2.f32 %v275_v13  ;;  %v285_v27 = vsel %vm284_vm2, %v280_v10, %v279_v26 }
  0x34   : > { %547 = vpow2.f32 %v281_v14  ;;  %v291_v29 = vsel %vm290_vm3, %v286_v11, %v285_v27  ;;  %p639_p13 = pnand %p638_p10, %p634_p6 }
  0x35   : > { %549 = vpow2.f32 %v287_v15 }
  0x38   : > { %v544_v18 = vpop.eup %543 }
  0x39   : > { %v546_v19 = vpop.eup %545 }
  0x3a   : > { %v548_v20 = vpop.eup %547  ;;  %v277_v21 = vadd.f32 %v546_v19, %v544_v18 }
  0x3b   : > { %v550_v22 = vpop.eup %549 }
  0x3c   : > { %v283_v23 = vadd.f32 %v548_v20, %v277_v21 }
  0x3e   : > { %v289_v25 = vadd.f32 %v550_v22, %v283_v23 }
  0x40   : > { %551 = vlog2.f32 %v289_v25 }
  0x46   : > { %v552_v28 = vpop.eup %551 }
  0x47   : > { %v293_v30 = vmul.f32 0.6931472, %v552_v28 }
  0x49   : > { %v294_v31 = vsub.f32 %v291_v29, %v293_v30 }
  0x4b   : > { %v295_v32 = vsub.f32 0.0, %v294_v31 }
  0x4d   : > { %v296_v33 = vsub.f32 0.0, %v295_v32 }
  0x4f   : > { %v297_v34 = vmul.f32 1.442695, %v296_v33 }
  0x51   : > { %553 = vpow2.f32 %v297_v34 }
  0x57   : > { %v554_v35 = vpop.eup %553 }
  0x58   : > { %v299_v36 = vsub.f32 1.0, %v554_v35 }
  0x5a   : > { %v300_v37 = vmul.f32 %v299_v36, %v299_v36 }
  0x5c   : > { %v301_v39 = vmul.f32 %v300_v37, %v295_v32 }
  0x5e   : > { %v309_v40 = vadd.f32 %v308_v38, %v301_v39 }
  0x60   : > { %310 = vst [vmem:[#allocation2] sm:$0x3] %v309_v40 }
  0x67   : > { %v332_v41 = vld [vmem:[#allocation2] sm:$0x3] }
  0x68   : > { %333 = vst [vmem:[%s243_s16] sm:$0x3] %v332_v41 }
  0x69   : > { %642 = shalt.err (!%p639_p13)
}
  0x6a   : > { %477 = dma.vmem_to_hbm [thread:$0]  (%p772_p9), %s349_s18, 32, %s351_s20, %s335_s26  }
  0x6b PF: > { %s362_s29 = sand.u32 1, %s681_s9   ;;  %p487_p0 = pnand %p458_p12, %p779_p11 }
  0x6c   : > { %s363_s25 = scalar_lea.sflag [#allocation5], %s362_s29 }
  0x6d   : > { %p488_p1 = pneg %p487_p0 }
  0x6f   : > { %676 = dma.done.wait (%p488_p1), %s363_s25, 32  }
  0x70   : > { %678 = vsyncadd (%p488_p1), %s363_s25, 4294967264  ;;  %s21_s14 = sadd.s32 1, %s701_s14   ;;  %s868_s9 = smov %s685_s10 }
  0x71   : > { %p18_p2 = scmp.ge.s32.totalorder %s21_s14, 4   ;;  %s869_s10 = smov %s689_s11 }
  0x72   : > { %s870_s11 = smov %s777_s23  ;;  %s871_s12 = smov %s697_s13 }
  0x73   : > { %s872_s13 = smov %s874_s17  ;;  %20 = sbr.rel (!%p18_p2) target bundleno = 8 (0x8), region = 105 }
  0x78   :  { %369 = vsyncpa [#allocation4], 1 }
  0x79   :  { %371 = vsyncpa [#allocation4 + $0x1], 1 }
  0x7a   :  { %372 = vsyncpa [#allocation7], 1 }
  0x7b   :  { %374 = vsyncpa [#allocation7 + $0x1], 1 }
  0x7c   :  { %375 = vsyncpa [#allocation5], 1 }
  0x7d   :  { %377 = vsyncpa [#allocation5 + $0x1], 1 }

</bundles_post_ra>
